<compile_context>
chip_gen: v7x
topology: tpu7x:2x2x1
jax: 0.10.0
libtpu: 0.0.40
codegen_flags: <defaults>
</compile_context>

<pallas_src>
import math
import functools

import jax
import jax.numpy as jnp
from jax import lax
from jax.experimental import pallas as pl
from jax.experimental.pallas import tpu as pltpu


def build_pe_table(d_model: int, max_len: int = 5000,
                   dtype=jnp.float32) -> jnp.ndarray:
    """Sinusoidal positional-encoding table, shape (max_len, d_model)."""
    position = jnp.arange(0, max_len, dtype=jnp.float32)[:, None]          # (L, 1)
    div_term = jnp.exp(jnp.arange(0, d_model, 2, dtype=jnp.float32)
                       * (-math.log(10000.0) / d_model))                   # (D/2,)
    pe = jnp.zeros((max_len, d_model), dtype=jnp.float32)
    pe = pe.at[:, 0::2].set(jnp.sin(position * div_term))
    pe = pe.at[:, 1::2].set(jnp.cos(position * div_term))
    return pe.astype(dtype)


def _cdiv(a: int, b: int) -> int:
    return -(-a // b)


def _round_up(a: int, m: int) -> int:
    return _cdiv(a, m) * m


def _choose_tiles(B: int, S: int, D: int, itemsize: int,
                  target_block_bytes: int = 2 * 1024 * 1024):
    """Pick (batch_tile, seq_tile) so each x/out block is ~2 MiB.

    seq_tile is always a multiple of 8 (dense sublanes, legal against both the
    (B,S,D) activation and the (max_len,D) PE table).  Total VMEM use with
    default double buffering is ~6 blocks ~= 12 MiB, safe on every generation
    (v7x: 64 MiB VMEM / 32 MiB scoped default; v5e scoped default 16 MiB).
    """
    row_bytes = max(D * itemsize, 1)
    rows_target = max(8, (target_block_bytes // row_bytes) // 8 * 8)
    ts = min(_round_up(S, 8), rows_target)          # seq tile, multiple of 8
    tb = max(1, min(B, rows_target // ts))          # grow batch tile if seq is short
    # Keep >=2 grid steps when possible so both v7x TensorCores get work.
    if B >= 2 and _cdiv(B, tb) * _cdiv(S, ts) < 2:
        tb = _cdiv(B, 2)
    return tb, ts


# Signed-int32 views of the uint32 hash constants (written signed so numpy
# never sees an out-of-range Python int).
_C_GOLDEN = -1640531527    # 0x9E3779B9
_C_MIX1 = -2049060245      # 0x85EBCA6B
_C_FM1 = 0x7FEB352D        # 2146095405
_C_FM2 = -2073343349       # 0x846CA68B


def _fmix32(x):
    """murmur3-style avalanche finalizer on int32 (wrapping arithmetic)."""
    srl = lax.shift_right_logical
    x = x ^ srl(x, 16)
    x = x * jnp.int32(_C_FM1)
    x = x ^ srl(x, 15)
    x = x * jnp.int32(_C_FM2)
    x = x ^ srl(x, 16)
    return x


def _pe_add_kernel(seed_ref, x_ref, pe_ref, o_ref, *,
                   dropout_p: float, training: bool):
    # x_ref / o_ref : (TB, TS, D)   pe_ref : (TS, D)   seed_ref : SMEM (1,) i32
    x = x_ref[...]
    pe = pe_ref[...]
    # Broadcast over the leading (non-vreg) batch-tile axis: free vreg reuse,
    # the add is pure vld/vadd/vst per vreg.
    out = x + pe[None, :, :]

    if training and dropout_p > 0.0:
        # Inverted dropout (torch.nn.Dropout semantics: drop with prob p,
        # scale kept values by 1/(1-p)).  Counter-based hash RNG built from
        # plain int32 VPU ops, so it lowers both on Mosaic-TPU and in
        # interpret mode.  Seed is mixed with the grid position so masks are
        # decorrelated across blocks and across calls.
        shape = out.shape
        lin = (lax.broadcasted_iota(jnp.int32, shape, 0)
               * jnp.int32(shape[1] * shape[2])
               + lax.broadcasted_iota(jnp.int32, shape, 1)
               * jnp.int32(shape[2])
               + lax.broadcasted_iota(jnp.int32, shape, 2))
        block_id = pl.program_id(0) * pl.num_programs(1) + pl.program_id(1)
        base = (seed_ref[0] * jnp.int32(_C_GOLDEN)
                + block_id * jnp.int32(_C_MIX1))
        key = _fmix32(lin + base)
        # Uniform in [0, 1) from the top 24 bits (logical shift -> nonneg).
        u = (lax.shift_right_logical(key, 8).astype(jnp.float32)
             * jnp.float32(1.0 / (1 << 24)))
        keep = u >= jnp.float32(dropout_p)
        scale = jnp.asarray(1.0 / (1.0 - dropout_p), dtype=out.dtype)
        out = jnp.where(keep, out * scale, jnp.zeros_like(out))

    o_ref[...] = out.astype(o_ref.dtype)


def positional_encoding(x: jnp.ndarray,
                        pe_table: jnp.ndarray,
                        *,
                        dropout_p: float = 0.1,
                        training: bool = False,
                        rng_seed=0,
                        prefer_xla_fusion_in_eval: bool = False) -> jnp.ndarray:
    """x: (S, B, D); pe_table: (max_len, D).  Returns dropout(x + pe[:S])."""
    S, B, D = x.shape
    assert pe_table.shape[1] == D and pe_table.shape[0] >= S

    # Match PE dtype to x so the kernel add stays in x's precision and PE DMA
    # bytes are not doubled when x is bf16.
    pe = pe_table if pe_table.dtype == x.dtype else pe_table.astype(x.dtype)

    if prefer_xla_fusion_in_eval and not (training and dropout_p > 0.0):
        # A lone broadcast-add is purely HBM-bound; letting XLA fuse it into
        # neighbouring ops avoids an extra full read+write of x.
        return x + pe[:S][:, None, :]

    # Batch-first, lane/sublane-dense layout for the kernel (layout plumbing
    # only; a full model would keep activations batch-first end-to-end).
    xb = jnp.transpose(x, (1, 0, 2))                      # (B, S, D)

    itemsize = jnp.dtype(x.dtype).itemsize
    tb, ts = _choose_tiles(B, S, D, itemsize)
    grid = (_cdiv(B, tb), _cdiv(S, ts))

    seed_arr = jnp.reshape(jnp.asarray(rng_seed, dtype=jnp.int32), (1,))

    kernel = functools.partial(_pe_add_kernel,
                               dropout_p=float(dropout_p),
                               training=bool(training))

    cost = pl.CostEstimate(
        flops=B * S * D,
        transcendentals=0,
        bytes_accessed=(2 * B * S * D + S * D) * itemsize)

    out_b = pl.pallas_call(
        kernel,
        out_shape=jax.ShapeDtypeStruct((B, S, D), x.dtype),
        grid_spec=pltpu.PrefetchScalarGridSpec(
            num_scalar_prefetch=1,                        # dropout seed (SMEM)
            grid=grid,
            in_specs=[
                # x tile (batch-tile, seq-tile, full D)
                pl.BlockSpec((tb, ts, D), lambda b, s, seed: (b, s, 0)),
                # PE rows picked straight from the full table (no wrapper slice)
                pl.BlockSpec((ts, D),     lambda b, s, seed: (s, 0)),
            ],
            out_specs=pl.BlockSpec((tb, ts, D), lambda b, s, seed: (b, s, 0)),
        ),
        compiler_params=pltpu.CompilerParams(
            dimension_semantics=("parallel", "parallel"),
            vmem_limit_bytes=32 * 1024 * 1024),
        cost_estimate=cost,
    )(seed_arr, xb, pe)

    return jnp.transpose(out_b, (1, 0, 2))                # back to (S, B, D)


if __name__ == "__main__":
    # Small shapes consistent with the module's forward: (seq, batch, d_model)
    S, B, D = 8, 2, 32
    key = jax.random.PRNGKey(0)
    x = jax.random.normal(key, (S, B, D), dtype=jnp.float32)

    pe_table = build_pe_table(d_model=D, max_len=5000)
    ref = x + pe_table[:S][:, None, :]

    # Eval-mode forward (dropout is identity), matching PyTorch module.eval().
    out = positional_encoding(x, pe_table, dropout_p=0.1, training=False)
    out = jax.block_until_ready(out)
    assert out.shape == (S, B, D)
    assert jnp.allclose(out, ref, atol=1e-6, rtol=1e-6)

    # Training-mode forward: every element is either dropped (0) or the
    # reference value scaled by 1/(1-p).
    p = 0.1
    out_tr = positional_encoding(x, pe_table, dropout_p=p, training=True,
                                 rng_seed=1234)
    out_tr = jax.block_until_ready(out_tr)
    scale = 1.0 / (1.0 - p)
    ok = (jnp.isclose(out_tr, 0.0, atol=1e-6)
          | jnp.isclose(out_tr, ref * scale, atol=1e-5, rtol=1e-5))
    assert bool(jnp.all(ok))

    print("KERNEL_OK")
</pallas_src>

<mosaic_0001>
module attributes {stable_mosaic.version = 11 : i64} {
  func.func @_pe_add_kernel(%arg0: i32, %arg1: i32, %arg2: memref<1xi32, #tpu.memory_space<smem>>, %arg3: memref<1x8x32xf32, #tpu.memory_space<vmem>>, %arg4: memref<8x32xf32, #tpu.memory_space<vmem>>, %arg5: memref<1x8x32xf32, #tpu.memory_space<vmem>>) attributes {dimension_semantics = [#tpu.dimension_semantics<parallel>, #tpu.dimension_semantics<parallel>], iteration_bounds = array<i64: 2, 1>, scalar_prefetch = 1 : i64, scratch_operands = 0 : i64, tpu.core_type = #tpu.core_type<tc>, window_params = [{transform_indices = @transform_0, window_bounds = array<i64: 1, 8, 32>}, {transform_indices = @transform_1, window_bounds = array<i64: 8, 32>}, {transform_indices = @transform_2, window_bounds = array<i64: 1, 8, 32>}]} {
    %c0 = arith.constant 0 : index
    %c0_0 = arith.constant 0 : index
    %c0_1 = arith.constant 0 : index
    %0 = vector.load %arg3[%c0, %c0_0, %c0_1] : memref<1x8x32xf32, #tpu.memory_space<vmem>>, vector<1x8x32xf32>
    %c0_2 = arith.constant 0 : index
    %c0_3 = arith.constant 0 : index
    %1 = vector.load %arg4[%c0_2, %c0_3] : memref<8x32xf32, #tpu.memory_space<vmem>>, vector<8x32xf32>
    %2 = vector.shape_cast %1 : vector<8x32xf32> to vector<1x8x32xf32>
    %3 = arith.addf %0, %2 : vector<1x8x32xf32>
    %c0_4 = arith.constant 0 : index
    %c0_5 = arith.constant 0 : index
    %c0_6 = arith.constant 0 : index
    %4 = vector.load %arg5[%c0_4, %c0_5, %c0_6] : memref<1x8x32xf32, #tpu.memory_space<vmem>>, vector<1x8x32xf32>
    tpu.vector_store %arg5[%c0_4, %c0_5, %c0_6], %3 {strides = array<i32>} : memref<1x8x32xf32, #tpu.memory_space<vmem>>, vector<1x8x32xf32>,
    return
  }
  func.func @transform_0(%arg0: i32, %arg1: i32, %arg2: memref<1xi32, #tpu.memory_space<smem>>) -> (i32, i32, i32) {
    %c0_i32 = arith.constant 0 : i32
    %c0_i32_0 = arith.constant 0 : i32
    return %arg0, %arg1, %c0_i32 : i32, i32, i32
  }
  func.func @transform_1(%arg0: i32, %arg1: i32, %arg2: memref<1xi32, #tpu.memory_space<smem>>) -> (i32, i32) {
    %c0_i32 = arith.constant 0 : i32
    %c0_i32_0 = arith.constant 0 : i32
    return %arg1, %c0_i32 : i32, i32
  }
  func.func @transform_2(%arg0: i32, %arg1: i32, %arg2: memref<1xi32, #tpu.memory_space<smem>>) -> (i32, i32, i32) {
    %c0_i32 = arith.constant 0 : i32
    %c0_i32_0 = arith.constant 0 : i32
    return %arg0, %arg1, %c0_i32 : i32, i32, i32
  }
}

</mosaic_0001>

<bundles_post_ra>
// kernel: tpu_custom_call.1
= control target key start
LH: loop header
LB: loop body
LE: loop exit
PB: predicated region body
PF: predicated region fallthrough
CT: control target
= control target key end

     0   :  { %9 = vsyncpa [#allocation5], 0  ;;  %s572_s0 = inlined_call_operand.<no memory space> [shape: s32[1], index: 0, kind: input, shape index: {}]   ;;  %s573_s1 = inlined_call_operand.vmem [shape: f32[2,8,32], index: 1, kind: input, shape index: {}]   ;;  %s574_s2 = inlined_call_operand.vmem [shape: f32[5000,32], index: 2, kind: input, shape index: {}]   ;;  %s575_s3 = inlined_call_operand.hbm [shape: f32[2,8,32], index: 3, kind: output, shape index: {}]  }
   0x1   :  { %11 = vsyncpa [#allocation5 + $0x1], 0  ;;  %s457_s12 = smov 0   ;;  %s459_s13 = smov 0  }
   0x2   :  { %s461_s14 = smov 0   ;;  %s463_s15 = smov 0  }
   0x3   :  { %s465_s0 = smov 0   ;;  %s467_s16 = smov 0  }
   0x4 LB: > { %s289_s17 = sadd.s32 4294967295, %s434_s16   ;;  %s290_s18 = sadd.s32 4294967294, %s434_s16   ;;  %s434_s16 = sphi %s467_s16, %s17_s16   ;;  %s430_s0 = sphi %s465_s0, %s582_s0   ;;  %s426_s15 = sphi %s463_s15, %s581_s15   ;;  %s422_s14 = sphi %s461_s14, %s580_s14   ;;  %s418_s13 = sphi %s459_s13, %s579_s13   ;;  %s414_s12 = sphi %s457_s12, %s578_s12  }
   0x5   : > { %s29_s19 = sadd.s32 1, %s430_s0  ;;  %s92_s20 = sadd.s32 1, %s422_s14 }
   0x6   : > { %p31_p0 = scmp.ge.s32.totalorder %s29_s19, 2  ;;  %p102_p1 = scmp.ne.s32.totalorder %s422_s14, %s418_s13 }
   0x7   : > { %p103_p2 = scmp.eq.s32.totalorder %s289_s17, 1  ;;  %p108_p3 = scmp.ne.s32.totalorder %s418_s13, %s414_s12 }
   0x8   : > { %s584_s19 = smov (%p31_p0, %s29_s19), 0  ;;  %p109_p5 = scmp.eq.s32.totalorder %s290_s18, 1 }
   0x9   : > { %p497_p4 = por %p103_p2, %p102_p1  ;;  %s87_s22 = ssub.s32 %s430_s0, %s584_s19 }
   0xa   : > { %p294_p6 = scmp.ge.s32.totalorder %s434_s16, 1  ;;  %p90_p7 = scmp.eq.s32.totalorder %s87_s22, 0 }
   0xb   : > { %p504_p8 = por %p109_p5, %p108_p3  ;;  %p144_p9 = scmp.lt.s32.totalorder %s434_s16, 3 }
   0xc   : > { %s510_s24 = scalar_select %p90_p7, %s422_s14, %s92_s20  }
   0xd   : > { %p145_p10 = pnand %p294_p6, %p144_p9 }
   0xe   : > { %s169_s25 = sand.u32 (!%p145_p10), 1, %s418_s13   ;;  %p172_p11 = scmp.lt.s32.totalorder (!%p145_p10), %s426_s15, 1  ;;  %v184_v0 = vld [vmem:[%s574_s2] sm:$0xff] (!%p145_p10)  ;;  %vm186_vm0 = vcmask (!%p145_p10), 261120  }
   0xf   : > { %148 = sbr.rel (%p145_p10) target bundleno = 43 (0x2b), region = 28  ;;  %s295_s26 = sshll.u32 (!%p145_p10), %s169_s25, 3 }
  0x10   : > { %s298_s28 = sshll.u32 (!%p145_p10), %s426_s15, 7  ;;  %s171_s5 = scalar_lea.vmem (!%p145_p10), [#allocation4], %s295_s26 }
  0x11   : > { %s203_s6 = sshll.u32 (!%p145_p10), %s171_s5, 4  ;;  %s189_s17 = scalar_lea.sflag (!%p145_p10), [#allocation5], %s169_s25  ;;  %s522_s6 = int_to_ptr.vmem [resolvable:$true] %s203_s6 }
  0x12   : > { %s356_s18 = scalar_lea.vmem (!%p145_p10), %s522_s6, 128  ;;  %s436_s20 = smov (!%p145_p10), [#allocation4]  }
  0x13   : > { %p357_p12 = scmp.ne.s32.totalorder (!%p145_p10), %s522_s6, %s356_s18  ;;  %s360_s22 = sshll.u32 (!%p145_p10), %s436_s20, 4  ;;  %s361_s22 = int_to_ptr.vmem [resolvable:$false] %s360_s22 }
  0x14   : > { %s362_s26 = scalar_lea.vmem (!%p145_p10), %s361_s22, 256  ;;  %p363_p1 = scmp.lt.s32.totalorder (!%p145_p10), %s522_s6, %s361_s22 }
  0x15   : > { %p358_p13 = pnand (!%p145_p10), %p357_p12, %p497_p4  ;;  %p364_p2 = scmp.lt.s32.totalorder (!%p145_p10), %s362_s26, %s356_s18 }
  0x16   : > { %s173_s27 = scalar_select %p172_p11, %s426_s15, 1 }
  0x17   : > { %s527_s15 = scalar_lea.hbm %s575_s3, %s298_s28  ;;  %p359_p0 = pneg %p358_p13 }
  0x18   : > { %s296_s29 = sshll.u32 %s173_s27, 3  ;;  %p365_p3 = por %p364_p2, %p363_p1 }
  0x19   : > { %s178_s9 = scalar_lea.vmem %s573_s1, %s296_s29 }
  0x1a   : > { %v183_v1 = vld [vmem:[%s178_s9] sm:$0xff]  ;;  %p366_p5 = pnand %p365_p3, %p359_p0 }
  0x1b   : > { %v185_v2 = vadd.f32 %v184_v0, %v183_v1 }
  0x1d   : > { %187 = vst.msk [vmem:[%s171_s5] sm:$0xff] %vm186_vm0, %v185_v2 }
  0x1e   : > { %369 = shalt.err (!%p366_p5)
}
  0x1f   : > { %s370_s25 = scalar_lea.hbm %s527_s15, 128  ;;  %s374_s29 = scalar_lea.hbm %s575_s3, 256 }
  0x20   : > { %p371_p6 = scmp.ne.s32.totalorder %s527_s15, %s370_s25  ;;  %p375_p10 = scmp.lt.u32.totalorder %s527_s15, %s575_s3 }
  0x21   : > { %p376_p11 = scmp.lt.u32.totalorder %s374_s29, %s370_s25  ;;  %p378_p13 = scmp.lt.u32.totalorder %s370_s25, %s527_s15 }
  0x22   : > { %p372_p7 = pnand %p371_p6, %p497_p4 }
  0x23   : > { %p377_p12 = por %p376_p11, %p375_p10 }
  0x24   : > { %p373_p9 = pneg %p372_p7 }
  0x25   : > { %p379_p0 = por %p378_p13, %p377_p12 }
  0x27   : > { %p380_p1 = pnand %p379_p0, %p373_p9 }
  0x29   : > { %383 = shalt.err (!%p380_p1)
}
  0x2a   : > { %301 = dma.vmem_to_hbm [thread:$0]  (%p497_p4), %s522_s6, 128, %s527_s15, %s189_s17  }
  0x2b PF: > { %p307_p2 = scmp.ge.s32.totalorder %s434_s16, 2  ;;  %s215_s5 = sand.u32 1, %s414_s12  }
  0x2c   : > { %s216_s7 = scalar_lea.sflag [#allocation5], %s215_s5 }
  0x2d   : > { %p304_p3 = pnand %p307_p2, %p504_p8 }
  0x2f   : > { %409 = dma.done.wait (!%p304_p3), %s216_s7, 128  }
  0x30   : > { %411 = vsyncadd (!%p304_p3), %s216_s7, 4294967168  ;;  %s17_s16 = sadd.s32 1, %s434_s16   ;;  %s578_s12 = smov %s418_s13 }
  0x31   : > { %p14_p5 = scmp.ge.s32.totalorder %s17_s16, 4   ;;  %s579_s13 = smov %s422_s14 }
  0x32   : > { %s580_s14 = smov %s510_s24  ;;  %s581_s15 = smov %s430_s0 }
  0x33   : > { %s582_s0 = smov %s584_s19  ;;  %16 = sbr.rel (!%p14_p5) target bundleno = 4 (0x4), region = 66 }
  0x3a   :  { %221 = vsyncpa [#allocation5], 1 }
  0x3b   :  { %223 = vsyncpa [#allocation5 + $0x1], 1 }

</bundles_post_ra>
